<compile_context>
chip_gen: v7x
topology: tpu7x:2x2x1
jax: 0.10.0
libtpu: 0.0.40
codegen_flags: <defaults>
</compile_context>

<pallas_src>
import jax
import jax.numpy as jnp
from jax.experimental import pallas as pl
from jax.experimental.pallas import tpu as pltpu


# ---------------------------------------------------------------------------
# Phase 1: per-tile normalize + accumulate global sum / sum-of-squares.
# The two (1,1) outputs use a constant block index, so they stay resident in
# VMEM across the whole ("arbitrary") grid axis and act as accumulators.
# ---------------------------------------------------------------------------
def _reduce_kernel(x_ref, mean_ref, inv_std_ref, sum_ref, sumsq_ref):
    @pl.when(pl.program_id(0) == 0)
    def _():
        sum_ref[...] = jnp.zeros_like(sum_ref)
        sumsq_ref[...] = jnp.zeros_like(sumsq_ref)

    nrm = (x_ref[...] - mean_ref[...]) * inv_std_ref[...]
    sum_ref[...] += jnp.sum(nrm)
    sumsq_ref[...] += jnp.sum(nrm * nrm)


# ---------------------------------------------------------------------------
# Phase 2: normalize again per tile and add the pre-scaled Gaussian noise.
# scale = input_std * alpha_i (a single SMEM scalar shared by all grid steps).
# ---------------------------------------------------------------------------
def _normalize_noise_kernel(scale_ref, x_ref, mean_ref, inv_std_ref, z_ref, o_ref):
    nrm = (x_ref[...] - mean_ref[...]) * inv_std_ref[...]
    o_ref[...] = nrm + z_ref[...] * scale_ref[0]


# Pure normalization (input_noise == False): no reduction, no PRNG, one pass.
def _normalize_kernel(x_ref, mean_ref, inv_std_ref, o_ref):
    o_ref[...] = (x_ref[...] - mean_ref[...]) * inv_std_ref[...]


def _row_tiling(nc, hw, target_bytes=1 << 20):
    """Pick a row-tile TM (multiple of 8, or the full NC) of ~target_bytes."""
    bytes_per_row = hw * 4
    rows = max(1, target_bytes // bytes_per_row)
    if rows >= nc:
        tm = nc                      # single block covers all rows
    else:
        tm = max(8, (rows // 8) * 8)  # keep the (8,128) sublane constraint
    nc_pad = ((nc + tm - 1) // tm) * tm
    return tm, nc_pad


def noise_normalize_forward(x, mean, std, alpha_i, seed, input_noise=True):
    """x: (N, C, H, W) float32; mean/std: (C,); alpha_i: float; seed: int."""
    N, C, H, W = x.shape
    NC, HW = N * C, H * W
    TM, NC_pad = _row_tiling(NC, HW)
    grid = (NC_pad // TM,)

    x2 = x.astype(jnp.float32).reshape(NC, HW)
    mean_col = jnp.tile(mean.astype(jnp.float32), N).reshape(NC, 1)
    inv_std_col = jnp.tile(1.0 / std.astype(jnp.float32), N).reshape(NC, 1)
    if NC_pad > NC:
        pad = ((0, NC_pad - NC), (0, 0))
        # Zero padding => padded rows normalize to exactly 0 and do not
        # perturb the global sums; padded output rows are sliced off below.
        x2 = jnp.pad(x2, pad)
        mean_col = jnp.pad(mean_col, pad)
        inv_std_col = jnp.pad(inv_std_col, pad)

    x_spec = pl.BlockSpec((TM, HW), lambda i: (i, 0))
    col_spec = pl.BlockSpec((TM, 1), lambda i: (i, 0))
    scalar_out_spec = pl.BlockSpec((1, 1), lambda i: (0, 0))
    vmem_cap = 32 * 1024 * 1024

    if not input_noise:
        # Static gate: skip the global-std reduction and the noise path.
        out2 = pl.pallas_call(
            _normalize_kernel,
            out_shape=jax.ShapeDtypeStruct((NC_pad, HW), jnp.float32),
            grid=grid,
            in_specs=[x_spec, col_spec, col_spec],
            out_specs=x_spec,
            compiler_params=pltpu.CompilerParams(
                dimension_semantics=("parallel",),
                vmem_limit_bytes=vmem_cap),
        )(x2, mean_col, inv_std_col)
        return out2[:NC].reshape(N, C, H, W)

    # ---- phase 1: global sum / sum-of-squares of the normalized tensor ----
    s, sq = pl.pallas_call(
        _reduce_kernel,
        out_shape=(jax.ShapeDtypeStruct((1, 1), jnp.float32),
                   jax.ShapeDtypeStruct((1, 1), jnp.float32)),
        grid=grid,
        in_specs=[x_spec, col_spec, col_spec],
        out_specs=(scalar_out_spec, scalar_out_spec),
        compiler_params=pltpu.CompilerParams(
            dimension_semantics=("arbitrary",),
            vmem_limit_bytes=vmem_cap),
    )(x2, mean_col, inv_std_col)

    n = float(NC * HW)                          # real (unpadded) element count
    mu = s[0, 0] / n
    var = (sq[0, 0] - n * mu * mu) / (n - 1.0)  # unbiased, like torch .std()
    input_std = jnp.sqrt(jnp.maximum(var, 0.0))

    # Standard-normal noise; the noise stream will not match PyTorch's RNG
    # bit-for-bit (expected). Scaled inside the kernel by input_std * alpha_i.
    z2 = jax.random.normal(jax.random.PRNGKey(seed), (NC_pad, HW),
                           dtype=jnp.float32)
    scale = (input_std * jnp.float32(alpha_i)).reshape(1).astype(jnp.float32)

    # ---- phase 2: normalize + add noise, fully parallel over row tiles ----
    out2 = pl.pallas_call(
        _normalize_noise_kernel,
        out_shape=jax.ShapeDtypeStruct((NC_pad, HW), jnp.float32),
        grid=grid,
        in_specs=[pl.BlockSpec(memory_space=pltpu.SMEM),   # scale scalar
                  x_spec, col_spec, col_spec, x_spec],
        out_specs=x_spec,
        compiler_params=pltpu.CompilerParams(
            dimension_semantics=("parallel",),
            vmem_limit_bytes=vmem_cap),
    )(scale, x2, mean_col, inv_std_col, z2)

    return out2[:NC].reshape(N, C, H, W)


if __name__ == "__main__":
    key = jax.random.PRNGKey(0)
    N, C, H, W = 2, 4, 16, 16
    x = jax.random.normal(key, (N, C, H, W), dtype=jnp.float32)

    # Module parameters: mean/std are (C,1,1) buffers, alpha_i init 0.25.
    mean = jnp.array([0.5, 0.4, 0.3, 0.2], dtype=jnp.float32)
    std = jnp.array([0.2, 0.25, 0.3, 0.35], dtype=jnp.float32)
    alpha_i = 0.25

    out = noise_normalize_forward(x, mean, std, alpha_i, seed=1234,
                                  input_noise=True)
    out = jax.block_until_ready(out)
    assert out.shape == (N, C, H, W) and out.dtype == jnp.float32

    # With input_noise=False the result is exactly the normalization.
    out_clean = noise_normalize_forward(x, mean, std, alpha_i, seed=1234,
                                        input_noise=False)
    out_clean = jax.block_until_ready(out_clean)
    ref = (x - mean[None, :, None, None]) / std[None, :, None, None]
    assert jnp.allclose(out_clean, ref, rtol=1e-5, atol=1e-5)

    # Statistical sanity on the noise branch: std(out - normalized) should be
    # close to alpha_i * unbiased-std(normalized) (2048 samples -> ~1.6% 1-sigma).
    noise_part = out - out_clean
    expected = float(alpha_i * jnp.std(ref, ddof=1))
    measured = float(jnp.std(noise_part))
    assert abs(measured - expected) / expected < 0.2

    print("KERNEL_OK")
</pallas_src>

<mosaic_0001>
module attributes {stable_mosaic.version = 11 : i64} {
  func.func @_reduce_kernel(%arg0: i32, %arg1: memref<8x256xf32, #tpu.memory_space<vmem>>, %arg2: memref<8x1xf32, #tpu.memory_space<vmem>>, %arg3: memref<8x1xf32, #tpu.memory_space<vmem>>, %arg4: memref<1x1xf32, #tpu.memory_space<vmem>>, %arg5: memref<1x1xf32, #tpu.memory_space<vmem>>) attributes {dimension_semantics = [#tpu.dimension_semantics<arbitrary>], iteration_bounds = array<i64: 1>, scalar_prefetch = 0 : i64, scratch_operands = 0 : i64, tpu.core_type = #tpu.core_type<tc>, window_params = [{transform_indices = @transform_0, window_bounds = array<i64: 8, 256>}, {transform_indices = @transform_1, window_bounds = array<i64: 8, 1>}, {transform_indices = @transform_2, window_bounds = array<i64: 8, 1>}, {pipeline_mode = #tpu.pipeline_mode<synchronous>, transform_indices = @transform_3, window_bounds = array<i64: 1, 1>}, {pipeline_mode = #tpu.pipeline_mode<synchronous>, transform_indices = @transform_4, window_bounds = array<i64: 1, 1>}]} {
    %c0_i32 = arith.constant 0 : i32
    %0 = arith.cmpi eq, %arg0, %c0_i32 : i32
    %1 = arith.extui %0 : i1 to i32
    %c0_i32_0 = arith.constant 0 : i32
    %2 = arith.cmpi ne, %1, %c0_i32_0 : i32
    scf.if %2 {
      %cst_15 = arith.constant 0.000000e+00 : f32
      %27 = vector.broadcast %cst_15 : f32 to vector<1x1xf32>
      %c0_16 = arith.constant 0 : index
      %c0_17 = arith.constant 0 : index
      %28 = vector.load %arg4[%c0_16, %c0_17] : memref<1x1xf32, #tpu.memory_space<vmem>>, vector<1x1xf32>
      tpu.vector_store %arg4[%c0_16, %c0_17], %27 {strides = array<i32>} : memref<1x1xf32, #tpu.memory_space<vmem>>, vector<1x1xf32>,
      %cst_18 = arith.constant 0.000000e+00 : f32
      %29 = vector.broadcast %cst_18 : f32 to vector<1x1xf32>
      %c0_19 = arith.constant 0 : index
      %c0_20 = arith.constant 0 : index
      %30 = vector.load %arg5[%c0_19, %c0_20] : memref<1x1xf32, #tpu.memory_space<vmem>>, vector<1x1xf32>
      tpu.vector_store %arg5[%c0_19, %c0_20], %29 {strides = array<i32>} : memref<1x1xf32, #tpu.memory_space<vmem>>, vector<1x1xf32>,
    } else {
    }
    %c0 = arith.constant 0 : index
    %c0_1 = arith.constant 0 : index
    %3 = vector.load %arg1[%c0, %c0_1] : memref<8x256xf32, #tpu.memory_space<vmem>>, vector<8x256xf32>
    %c0_2 = arith.constant 0 : index
    %c0_3 = arith.constant 0 : index
    %4 = vector.load %arg2[%c0_2, %c0_3] : memref<8x1xf32, #tpu.memory_space<vmem>>, vector<8x1xf32>
    %5 = vector.broadcast %4 : vector<8x1xf32> to vector<8x256xf32>
    %6 = arith.subf %3, %5 : vector<8x256xf32>
    %c0_4 = arith.constant 0 : index
    %c0_5 = arith.constant 0 : index
    %7 = vector.load %arg3[%c0_4, %c0_5] : memref<8x1xf32, #tpu.memory_space<vmem>>, vector<8x1xf32>
    %8 = vector.broadcast %7 : vector<8x1xf32> to vector<8x256xf32>
    %9 = arith.mulf %6, %8 : vector<8x256xf32>
    %c0_6 = arith.constant 0 : index
    %c0_7 = arith.constant 0 : index
    %10 = vector.load %arg4[%c0_6, %c0_7] : memref<1x1xf32, #tpu.memory_space<vmem>>, vector<1x1xf32>
    %11 = vector.shape_cast %9 : vector<8x256xf32> to vector<1x8x256xf32>
    %cst = arith.constant dense<0.000000e+00> : vector<1xf32>
    %12 = vector.multi_reduction <add>, %11, %cst [1, 2] : vector<1x8x256xf32> to vector<1xf32>
    %13 = vector.shape_cast %12 : vector<1xf32> to vector<1x1x1xf32>
    %14 = vector.extract %13[0, 0, 0] : f32 from vector<1x1x1xf32>
    %15 = vector.broadcast %14 : f32 to vector<1x1xf32>
    %16 = arith.addf %10, %15 : vector<1x1xf32>
    %c0_8 = arith.constant 0 : index
    %c0_9 = arith.constant 0 : index
    %17 = vector.load %arg4[%c0_8, %c0_9] : memref<1x1xf32, #tpu.memory_space<vmem>>, vector<1x1xf32>
    tpu.vector_store %arg4[%c0_8, %c0_9], %16 {strides = array<i32>} : memref<1x1xf32, #tpu.memory_space<vmem>>, vector<1x1xf32>,
    %c0_10 = arith.constant 0 : index
    %c0_11 = arith.constant 0 : index
    %18 = vector.load %arg5[%c0_10, %c0_11] : memref<1x1xf32, #tpu.memory_space<vmem>>, vector<1x1xf32>
    %19 = arith.mulf %9, %9 : vector<8x256xf32>
    %20 = vector.shape_cast %19 : vector<8x256xf32> to vector<1x8x256xf32>
    %cst_12 = arith.constant dense<0.000000e+00> : vector<1xf32>
    %21 = vector.multi_reduction <add>, %20, %cst_12 [1, 2] : vector<1x8x256xf32> to vector<1xf32>
    %22 = vector.shape_cast %21 : vector<1xf32> to vector<1x1x1xf32>
    %23 = vector.extract %22[0, 0, 0] : f32 from vector<1x1x1xf32>
    %24 = vector.broadcast %23 : f32 to vector<1x1xf32>
    %25 = arith.addf %18, %24 : vector<1x1xf32>
    %c0_13 = arith.constant 0 : index
    %c0_14 = arith.constant 0 : index
    %26 = vector.load %arg5[%c0_13, %c0_14] : memref<1x1xf32, #tpu.memory_space<vmem>>, vector<1x1xf32>
    tpu.vector_store %arg5[%c0_13, %c0_14], %25 {strides = array<i32>} : memref<1x1xf32, #tpu.memory_space<vmem>>, vector<1x1xf32>,
    return
  }
  func.func @transform_0(%arg0: i32) -> (i32, i32) {
    %c0_i32 = arith.constant 0 : i32
    %c0_i32_0 = arith.constant 0 : i32
    return %arg0, %c0_i32 : i32, i32
  }
  func.func @transform_1(%arg0: i32) -> (i32, i32) {
    %c0_i32 = arith.constant 0 : i32
    %c0_i32_0 = arith.constant 0 : i32
    return %arg0, %c0_i32 : i32, i32
  }
  func.func @transform_2(%arg0: i32) -> (i32, i32) {
    %c0_i32 = arith.constant 0 : i32
    %c0_i32_0 = arith.constant 0 : i32
    return %arg0, %c0_i32 : i32, i32
  }
  func.func @transform_3(%arg0: i32) -> (i32, i32) {
    %c0_i32 = arith.constant 0 : i32
    %c0_i32_0 = arith.constant 0 : i32
    %c0_i32_1 = arith.constant 0 : i32
    return %c0_i32, %c0_i32_0 : i32, i32
  }
  func.func @transform_4(%arg0: i32) -> (i32, i32) {
    %c0_i32 = arith.constant 0 : i32
    %c0_i32_0 = arith.constant 0 : i32
    %c0_i32_1 = arith.constant 0 : i32
    return %c0_i32, %c0_i32_0 : i32, i32
  }
}

</mosaic_0001>

<bundles_post_ra>
// kernel: tpu_custom_call.1
= control target key start
LH: loop header
LB: loop body
LE: loop exit
PB: predicated region body
PF: predicated region fallthrough
CT: control target
= control target key end

     0   :  { %10 = vsyncpa [#allocation3], 0  ;;  %s228_s0 = inlined_call_operand.vmem [shape: f32[8,256], index: 0, kind: input, shape index: {}]   ;;  %s229_s1 = inlined_call_operand.vmem [shape: f32[8,1], index: 1, kind: input, shape index: {}]   ;;  %s230_s2 = inlined_call_operand.vmem [shape: f32[8,1], index: 2, kind: input, shape index: {}]   ;;  %s231_s3 = inlined_call_operand.hbm [shape: f32[1,1], index: 3, kind: output, shape index: {0}]   ;;  %s232_s4 = inlined_call_operand.hbm [shape: f32[1,1], index: 4, kind: output, shape index: {1}]  }
   0x1   :  { %v27_v0 = vld [vmem:[%s229_s1] sm:$0xff] }
   0x2   :  { %11 = vsyncpa [#allocation5], 0  ;;  %v159_v1 = vmov 0   ;;  %v35_v2 = vld [vmem:[%s230_s2] sm:$0xff]  ;;  %v26_v5 = vld [vmem:[%s228_s0 + $0x8] sm:$0xff]  ;;  %vm22_vm0 = vcmask 0  }
   0x3   :  { %110 = vset.pattern.permute.xlu0 %v159_v1  ;;  %v25_v4 = vld [vmem:[%s228_s0] sm:$0xff]  ;;  %v160_v15 = vmov 0.0   ;;  %s161_s0 = smov [#allocation2]   ;;  %s162_s23 = smov [#allocation4]  }
   0x4   :  { %30 = vperm.xlu0 %110, %v27_v0   ;;  %23 = vst.msk [vmem:[#allocation2] sm:$0x1] %vm22_vm0, %v160_v15  ;;  %24 = vst.msk [vmem:[#allocation4] sm:$0x1] %vm22_vm0, %v160_v15  ;;  %s80_s1 = sshll.u32 %s161_s0, 4  ;;  %s90_s24 = sshll.u32 %s162_s23, 4  ;;  %s81_s1 = int_to_ptr.vmem [resolvable:$true] %s80_s1  ;;  %s91_s24 = int_to_ptr.vmem [resolvable:$true] %s90_s24 }
   0x5   :  { %s111_s26 = scalar_lea.vmem %s81_s1, 16  ;;  %s115_s27 = scalar_lea.vmem %s81_s1, 32 }
   0x6   :  { %p112_p0 = scmp.ne.s32.totalorder %s81_s1, %s111_s26  ;;  %p116_p1 = scmp.lt.s32.totalorder %s81_s1, %s81_s1 }
   0x7   :  { %p117_p2 = scmp.lt.s32.totalorder %s115_s27, %s111_s26 }
   0x8   :  { %38 = vperm.xlu0 %110, %v35_v2  }
   0x9   :  { %p118_p3 = por %p117_p2, %p116_p1 }
   0xb   :  { %v43_v30 = vld [vmem:[#allocation2] sm:$0x1]  ;;  %v58_v33 = vld [vmem:[#allocation4] sm:$0x1]  ;;  %p119_p4 = pnand %p118_p3, %p112_p0 }
  0x83   :  { %v31_v3 = vpop.permute.xlu0 %30 }
  0x84   :  { %v33_v6 = vsub.f32 %v25_v4, %v31_v3  ;;  %v34_v7 = vsub.f32 %v26_v5, %v31_v3 }
  0x87   :  { %v39_v8 = vpop.permute.xlu0 %38 }
  0x88   :  { %v41_v9 = vmul.f32 %v39_v8, %v33_v6  ;;  %v42_v10 = vmul.f32 %v39_v8, %v34_v7 }
  0x8a   :  { %v59_v11 = vmul.f32 %v41_v9, %v41_v9  ;;  %v60_v12 = vmul.f32 %v42_v10, %v42_v10  ;;  %v44_v13 = vadd.f32 %v42_v10, %v41_v9 }
  0x8c   :  { %45 = vadd.xlane.f32.xlu1 %v44_v13  ;;  %v61_v14 = vadd.f32 %v60_v12, %v59_v11 }
  0x90   :  { %62 = vadd.xlane.f32.xlu1 %v61_v14 }
 0x119   :  { %v46_v16 = vpop.xlane.xlu1 %45 }
 0x11a   :  { %v47_v17 = vrot.slane %v46_v16, 4 }
 0x11c   :  { %v48_v18 = vadd.f32 %v47_v17, %v46_v16 }
 0x11d   :  { %v63_v19 = vpop.xlane.xlu1 %62 }
 0x11e   :  { %v49_v20 = vrot.slane %v48_v18, 2  ;;  %v64_v21 = vrot.slane %v63_v19, 4 }
 0x120   :  { %v65_v22 = vadd.f32 %v64_v21, %v63_v19  ;;  %v50_v23 = vadd.f32 %v49_v20, %v48_v18 }
 0x122   :  { %v66_v24 = vrot.slane %v65_v22, 2  ;;  %v51_v25 = vrot.slane %v50_v23, 1 }
 0x124   :  { %v67_v26 = vadd.f32 %v66_v24, %v65_v22  ;;  %v52_v27 = vadd.f32 %v51_v25, %v50_v23 }
 0x126   :  { %102 = vpush %v52_v27  ;;  %v68_v28 = vrot.slane %v67_v26, 1 }
 0x128   :  { %v69_v29 = vadd.f32 %v68_v28, %v67_v26 }
 0x12a   :  { %104 = vpush %v69_v29 }
 0x157   :  { %s103_s2 = spop %102 }
 0x158   :  { %v54_v31 = vstv %s103_s2 }
 0x159   :  { %v55_v32 = vadd.f32 %v54_v31, %v43_v30 }
 0x15b   :  { %57 = vst.msk [vmem:[#allocation2] sm:$0x1] %vm22_vm0, %v55_v32  ;;  %s105_s25 = spop %104 }
 0x15c   :  { %v71_v34 = vstv %s105_s25 }
 0x15d   :  { %122 = shalt.err (!%p119_p4)
}
 0x15e   :  { %s123_s30 = scalar_lea.hbm %s231_s3, 16 }
 0x15f   :  { %p124_p5 = scmp.ne.s32.totalorder %s231_s3, %s123_s30  ;;  %p127_p6 = scmp.lt.u32.totalorder %s123_s30, %s231_s3 }
 0x161   :  { %p129_p7 = pnand %p127_p6, %p124_p5 }
 0x163   :  { %132 = shalt.err (!%p129_p7)
}
 0x164   :  { %83 = dma.vmem_to_hbm [thread:$0]  %s81_s1, 16, %s231_s3, [#allocation3]   ;;  %v72_v35 = vadd.f32 %v71_v34, %v58_v33 }
 0x165   :  { %s133_s11 = scalar_lea.vmem %s91_s24, 16  ;;  %s137_s12 = scalar_lea.vmem %s91_s24, 32 }
 0x166   :  { %73 = vst.msk [vmem:[#allocation4] sm:$0x1] %vm22_vm0, %v72_v35  ;;  %p134_p8 = scmp.ne.s32.totalorder %s91_s24, %s133_s11  ;;  %p138_p9 = scmp.lt.s32.totalorder %s91_s24, %s91_s24 }
 0x167   :  { %p139_p10 = scmp.lt.s32.totalorder %s137_s12, %s133_s11 }
 0x169   :  { %p140_p11 = por %p139_p10, %p138_p9 }
 0x16b   :  { %p141_p12 = pnand %p140_p11, %p134_p8 }
 0x16d   :  { %144 = shalt.err (!%p141_p12)
}
 0x16e   :  { %s145_s15 = scalar_lea.hbm %s232_s4, 16 }
 0x16f   :  { %p146_p13 = scmp.ne.s32.totalorder %s232_s4, %s145_s15  ;;  %p149_p0 = scmp.lt.u32.totalorder %s145_s15, %s232_s4 }
 0x171   :  { %p151_p1 = pnand %p149_p0, %p146_p13 }
 0x173   :  { %154 = shalt.err (!%p151_p1)
}
 0x174   :  { %93 = dma.vmem_to_hbm [thread:$0]  %s91_s24, 16, %s232_s4, [#allocation5]  }
 0x175   :  { %155 = dma.done.wait [#allocation3], 16  }
 0x176   :  { %156 = vsyncadd [#allocation3], 4294967280 }
 0x177   :  { %157 = dma.done.wait [#allocation5], 16  }
 0x178   :  { %158 = vsyncadd [#allocation5], 4294967280 }
 0x179   :  { %100 = vsyncpa [#allocation3], 1 }
 0x17a   :  { %101 = vsyncpa [#allocation5], 1 }

</bundles_post_ra>
